<compile_context>
chip_gen: v6e
topology: v6e:2x2x1
jax: 0.10.0
libtpu: 0.0.40
codegen_flags: <defaults>
</compile_context>

<pallas_src>
import functools

import numpy as np
import jax
import jax.numpy as jnp
from jax import lax
from jax.experimental import pallas as pl
from jax.experimental.pallas import tpu as pltpu


# ---------------------------------------------------------------------------
# In-kernel helpers
# ---------------------------------------------------------------------------

def _nms_and_store(row_max, vals_ref, rows_ref, *, num_cands, masked_area):
    """K-round non-max suppression on a (Bt, H) row-max tile (H on lanes).

    Writes pooled max values (f32) and arg-max rows (i32) per candidate into
    (Bt, num_cands) output refs.  All reductions are lane reductions.
    """
    bt, h = row_max.shape
    h_ids = lax.broadcasted_iota(jnp.int32, (bt, h), 1)
    rm = row_max
    for i in range(num_cands):                 # num_cands is tiny & static
        m = jnp.max(rm, axis=-1, keepdims=True)                     # (Bt, 1)
        # torch argmax returns the first flat index -> lowest row on ties.
        r = jnp.min(jnp.where(rm >= m, h_ids, jnp.int32(h)),
                    axis=-1, keepdims=True)                         # (Bt, 1)
        vals_ref[:, i:i + 1] = m
        rows_ref[:, i:i + 1] = r
        if i + 1 < num_cands:
            # Suppress rows within masked_area of this candidate's row
            # (-100 sentinel inherited from the PyTorch code).
            rm = jnp.where(jnp.abs(h_ids - r) < masked_area,
                           jnp.float32(-100.0), rm)
        # NOTE: max + masked-min are two fast lane reduces over ~1-2 vregs;
        # folding them into one packed-key reduce would cost more in relayouts.


def _nms_kernel(rm_ref, vals_ref, rows_ref, *, num_cands, masked_area):
    """Path 1: input is a pre-reduced, lane-dense (Bt, H) row-max tile."""
    _nms_and_store(rm_ref[...].astype(jnp.float32), vals_ref, rows_ref,
                   num_cands=num_cands, masked_area=masked_area)


def _rowmax_nms_kernel(x_ref, vals_ref, rows_ref, acc_ref, *,
                       num_cands, masked_area):
    """Path 2: (Bt, 1, H, Wt) map tiles; W is the trailing 'arbitrary' axis."""
    w = pl.program_id(1)

    @pl.when(w == 0)
    def _():
        acc_ref[...] = jnp.full_like(acc_ref, -jnp.inf)

    x = jnp.squeeze(x_ref[...], axis=1)                       # (Bt, H, Wt)
    acc_ref[...] = jnp.maximum(acc_ref[...],
                               jnp.max(x, axis=-1).astype(jnp.float32))

    @pl.when(w == pl.num_programs(1) - 1)
    def _():
        _nms_and_store(acc_ref[...], vals_ref, rows_ref,
                       num_cands=num_cands, masked_area=masked_area)


# ---------------------------------------------------------------------------
# Tiling helpers (generation-aware)
# ---------------------------------------------------------------------------

def _vmem_capacity_bytes():
    try:
        return int(pltpu.get_tpu_info().vmem_capacity_bytes)
    except Exception:
        return 64 << 20          # conservative fallback (v7x per-core VMEM)


def _batch_tile(itemsize):
    # Sublane multiple for the (Bt, H) / (Bt, K) blocks: 8 (f32) / 16 (bf16).
    return 8 * max(1, 4 // itemsize)


def _choose_w_tile(W, Bt, H, itemsize, vmem_budget):
    """Largest multiple-of-128 divisor of W whose double-buffered
    (Bt, 1, H, Wt) block fits `vmem_budget`, or None (lane-sparse / no fit)."""
    if W % 128 != 0:
        return None
    for wt in range(W, 0, -128):
        if W % wt == 0 and 2 * Bt * H * wt * itemsize <= vmem_budget:
            return wt
    return None


# ---------------------------------------------------------------------------
# Wrapper
# ---------------------------------------------------------------------------

def create_cands_pallas(out_conv, periods, fl_weight, fl_bias, *, num_cands,
                        masked_area=20, w_tile=None):
    """out_conv: (B, 1, H, W); returns candidates (num_cands*B, 4),
    rows ordered candidate-major (n = i*B + b) like torch's repeat()."""
    B, C, H, W = out_conv.shape
    # per_channel=False in the torch code only works for a 1-channel map
    # (its reshape would fail otherwise); the BlockSpec below still reads only
    # channel 0, so traffic stays 1x even for C>1.
    assert C == 1, "classifier channel dim must be 1"
    assert num_cands >= 1

    itemsize = jnp.dtype(out_conv.dtype).itemsize
    Bt = _batch_tile(itemsize)
    B_pad = ((B + Bt - 1) // Bt) * Bt
    grid_b = B_pad // Bt     # >=2 for B>=2*Bt -> sharded across v7x's two TCs

    vmem_cap = _vmem_capacity_bytes()
    if w_tile is None:
        w_tile = _choose_w_tile(W, Bt, H, itemsize, int(vmem_cap * 0.6))
    else:
        assert W % w_tile == 0 and w_tile % 128 == 0, \
            "w_tile must be a lane-dense divisor of W"

    if w_tile is not None:
        # ---- Path 2: lane-dense W -> in-kernel W-tiled row-max + NMS -------
        x = out_conv
        if B_pad != B:
            x = jnp.pad(x, ((0, B_pad - B), (0, 0), (0, 0), (0, 0)))
        grid_w = W // w_tile
        block_bytes = Bt * H * w_tile * itemsize
        vmem_limit = int(min(vmem_cap * 0.9, 2 * block_bytes + (8 << 20)))
        kernel = functools.partial(_rowmax_nms_kernel, num_cands=num_cands,
                                   masked_area=masked_area)
        vals, rows = pl.pallas_call(
            kernel,
            grid=(grid_b, grid_w),
            in_specs=[pl.BlockSpec((Bt, 1, H, w_tile),
                                   lambda b, w: (b, 0, 0, w))],
            out_specs=(pl.BlockSpec((Bt, num_cands), lambda b, w: (b, 0)),
                       pl.BlockSpec((Bt, num_cands), lambda b, w: (b, 0))),
            out_shape=(jax.ShapeDtypeStruct((B_pad, num_cands), jnp.float32),
                       jax.ShapeDtypeStruct((B_pad, num_cands), jnp.int32)),
            scratch_shapes=[pltpu.VMEM((Bt, H), jnp.float32)],
            compiler_params=pltpu.CompilerParams(
                dimension_semantics=("parallel", "arbitrary"),
                vmem_limit_bytes=vmem_limit),
        )(x)
    else:
        # ---- Path 1: lane-sparse W (e.g. 16) -> fused XLA reduce over W, ---
        # ---- then a lane-major (Bt, H) NMS kernel. --------------------------
        row_max = jnp.max(out_conv[:, 0], axis=-1)        # (B, H), native dtype
        if B_pad != B:
            row_max = jnp.pad(row_max, ((0, B_pad - B), (0, 0)))
        kernel = functools.partial(_nms_kernel, num_cands=num_cands,
                                   masked_area=masked_area)
        # TODO(synk): if steps ever become small & numerous, try
        # pipeline_mode=pl.Buffered(3) on the input BlockSpec.
        vals, rows = pl.pallas_call(
            kernel,
            grid=(grid_b,),
            in_specs=[pl.BlockSpec((Bt, H), lambda b: (b, 0))],
            out_specs=(pl.BlockSpec((Bt, num_cands), lambda b: (b, 0)),
                       pl.BlockSpec((Bt, num_cands), lambda b: (b, 0))),
            out_shape=(jax.ShapeDtypeStruct((B_pad, num_cands), jnp.float32),
                       jax.ShapeDtypeStruct((B_pad, num_cands), jnp.int32)),
            compiler_params=pltpu.CompilerParams(
                dimension_semantics=("parallel",)),
        )(row_max)

    vals = vals[:B]                                    # (B, K)
    rows = rows[:B]
    # torch stacking order from repeat(): n = i*B + b  -> transpose to (K, B).
    vals_flat = vals.T.reshape(-1)                     # (K*B,)
    rows_flat = rows.T.reshape(-1)

    # Tiny 1->2 linear head + period gather + channel column (fused XLA ops).
    w_col = fl_weight[:, 0].astype(jnp.float32)                         # (2,)
    logits = vals_flat[:, None] * w_col[None, :] \
        + fl_bias[None, :].astype(jnp.float32)                          # (K*B,2)
    cands_periods = periods[rows_flat][:, None].astype(jnp.float32)     # (K*B,1)
    chan = jnp.full((num_cands * B, 1), -1.0, jnp.float32)    # not per_channel
    return jnp.concatenate([logits, cands_periods, chan], axis=1)


@functools.partial(jax.jit,
                   static_argnames=("added_cands", "masked_area", "w_tile"))
def candidate_creator_forward(class_data, fl_weight, fl_bias, *,
                              added_cands=2, masked_area=20, w_tile=None):
    """forward(class_data, final_layer, channel_correction, target=None)
    with added_channel_cands=0, psr_cands=0, candidate_threshold=0."""
    out_conv, periods = class_data            # out_conv: (B, 1, H, W)
    if added_cands <= 0:                      # torch: empty candidates/target
        return jnp.zeros((0,), jnp.float32), jnp.zeros((0,), jnp.float32)
    candidates = create_cands_pallas(
        out_conv, periods, fl_weight, fl_bias,
        num_cands=added_cands, masked_area=masked_area, w_tile=w_tile)
    cand_target = jnp.zeros((0,), jnp.float32)    # target=None -> torch.empty(0)
    # TODO(synk): candidate_threshold>0 filtering, harmonic target relabelling,
    # per-channel and psr candidate paths need `target` and produce
    # data-dependent shapes; not active in this config.
    return candidates, cand_target


# ---------------------------------------------------------------------------
# Pure numpy reference (transcription of create_cands, per_channel=False)
# ---------------------------------------------------------------------------

def _reference_numpy(x_bchw, periods, fl_weight, fl_bias, num_cands,
                     masked_area=20):
    x = np.asarray(x_bchw, np.float64)
    periods = np.asarray(periods, np.float64)
    B, C, H, W = x.shape
    xr = np.tile(x, (num_cands, 1, 1, 1)).copy()
    rows_grid = np.arange(H).reshape(1, 1, H, 1)
    for i in range(num_cands):
        start, end = i * B, (i + 1) * B
        blk = xr[start:end].reshape(B, C, H * W)
        idx = blk.argmax(-1)
        max_row = (idx // W) % H
        if num_cands - i != 1:
            mask = np.abs(rows_grid - max_row[:, :, None, None]) < masked_area
            mask = np.broadcast_to(mask, (B, C, H, W))
            xr[end:][np.tile(mask, (num_cands - i - 1, 1, 1, 1))] = -100.0
    flat = xr.reshape(num_cands * B, C, H * W)
    idx = flat.argmax(-1)[:, 0]
    vals = flat.max(-1)[:, 0]
    rows = (idx // W) % H
    cands_periods = periods[rows]
    w = np.asarray(fl_weight, np.float64)[:, 0]
    b = np.asarray(fl_bias, np.float64)
    logits = vals[:, None] * w[None, :] + b[None, :]
    chan = -np.ones((num_cands * B, 1))
    return np.concatenate([logits, cands_periods[:, None], chan], axis=1)


# ---------------------------------------------------------------------------
# Self-test
# ---------------------------------------------------------------------------

if __name__ == "__main__":
    key = jax.random.PRNGKey(0)
    k1, k2, k3, kw, kb = jax.random.split(key, 5)

    # final_layer = nn.Linear(1, 2)
    fl_weight = jax.random.normal(kw, (2, 1), dtype=jnp.float32) * 0.5
    fl_bias = jax.random.normal(kb, (2,), dtype=jnp.float32) * 0.1

    def run_case(name, x_key, B, H, W, K, dtype, w_tile, masked_area=20):
        out_conv = jax.random.normal(x_key, (B, 1, H, W), dtype=jnp.float32)
        out_conv = out_conv.astype(dtype)
        periods = jnp.linspace(0.01, 2.0, H, dtype=jnp.float32)
        cands, tgt = candidate_creator_forward(
            (out_conv, periods), fl_weight, fl_bias,
            added_cands=K, masked_area=masked_area, w_tile=w_tile)
        cands = jax.block_until_ready(cands)
        tgt = jax.block_until_ready(tgt)
        ref = _reference_numpy(np.asarray(out_conv.astype(jnp.float32)),
                               np.asarray(periods),
                               np.asarray(fl_weight), np.asarray(fl_bias),
                               num_cands=K, masked_area=masked_area)
        assert cands.shape == (K * B, 4), (name, cands.shape)
        assert tgt.shape == (0,), (name, tgt.shape)
        np.testing.assert_allclose(np.asarray(cands), ref,
                                   rtol=1e-5, atol=1e-5, err_msg=name)

    # Path 1: lane-sparse W=16 -> wrapper W-reduce + lane-major NMS kernel.
    run_case("small_w_f32", k1, B=2, H=96, W=16, K=3,
             dtype=jnp.float32, w_tile=None)
    # Path 2: lane-dense W; 2 batch tiles x 2 W tiles exercise the VMEM
    # row-max accumulator and the ("parallel", "arbitrary") grid.
    run_case("tiled_w_f32", k2, B=16, H=128, W=256, K=2,
             dtype=jnp.float32, w_tile=128)
    # Path 2 with a native bf16 map (no upcast before the kernel).
    run_case("tiled_w_bf16", k3, B=4, H=96, W=256, K=2,
             dtype=jnp.bfloat16, w_tile=None)

    print("KERNEL_OK")
</pallas_src>

<mosaic_0001>
module attributes {stable_mosaic.version = 11 : i64} {
  func.func @_nms_kernel(%arg0: i32, %arg1: memref<8x96xf32, #tpu.memory_space<vmem>>, %arg2: memref<8x3xf32, #tpu.memory_space<vmem>>, %arg3: memref<8x3xi32, #tpu.memory_space<vmem>>) attributes {dimension_semantics = [#tpu.dimension_semantics<parallel>], iteration_bounds = array<i64: 1>, scalar_prefetch = 0 : i64, scratch_operands = 0 : i64, tpu.core_type = #tpu.core_type<tc>, window_params = [{transform_indices = @transform_0, window_bounds = array<i64: 8, 96>}, {transform_indices = @transform_1, window_bounds = array<i64: 8, 3>}, {transform_indices = @transform_2, window_bounds = array<i64: 8, 3>}]} {
    %c0 = arith.constant 0 : index
    %c0_0 = arith.constant 0 : index
    %0 = vector.load %arg1[%c0, %c0_0] : memref<8x96xf32, #tpu.memory_space<vmem>>, vector<8x96xf32>
    %1 = tpu.iota {dimensions = array<i32: 1>} : vector<8x96xi32>
    %cst = arith.constant dense<0xFF800000> : vector<8xf32>
    %2 = vector.multi_reduction <maximumf>, %0, %cst [1] : vector<8x96xf32> to vector<8xf32>
    %3 = vector.shape_cast %2 : vector<8xf32> to vector<8x1xf32>
    %4 = vector.broadcast %3 : vector<8x1xf32> to vector<8x96xf32>
    %5 = arith.cmpf oge, %0, %4 : vector<8x96xf32>
    %c96_i32 = arith.constant 96 : i32
    %6 = vector.broadcast %c96_i32 : i32 to vector<8x96xi32>
    %7 = arith.select %5, %1, %6 : vector<8x96xi1>, vector<8x96xi32>
    %cst_1 = arith.constant dense<2147483647> : vector<8xi32>
    %8 = vector.multi_reduction <minsi>, %7, %cst_1 [1] : vector<8x96xi32> to vector<8xi32>
    %9 = vector.shape_cast %8 : vector<8xi32> to vector<8x1xi32>
    %c0_2 = arith.constant 0 : index
    %c0_3 = arith.constant 0 : index
    %10 = vector.load %arg2[%c0_2, %c0_3] : memref<8x3xf32, #tpu.memory_space<vmem>>, vector<8x1xf32>
    tpu.vector_store %arg2[%c0_2, %c0_3], %3 {strides = array<i32>} : memref<8x3xf32, #tpu.memory_space<vmem>>, vector<8x1xf32>,
    %c0_4 = arith.constant 0 : index
    %c0_5 = arith.constant 0 : index
    %11 = vector.load %arg3[%c0_4, %c0_5] : memref<8x3xi32, #tpu.memory_space<vmem>>, vector<8x1xi32>
    tpu.vector_store %arg3[%c0_4, %c0_5], %9 {strides = array<i32>} : memref<8x3xi32, #tpu.memory_space<vmem>>, vector<8x1xi32>,
    %12 = vector.broadcast %9 : vector<8x1xi32> to vector<8x96xi32>
    %13 = arith.subi %1, %12 : vector<8x96xi32>
    %14 = math.absi %13 : vector<8x96xi32>
    %c20_i32 = arith.constant 20 : i32
    %15 = vector.broadcast %c20_i32 : i32 to vector<8x96xi32>
    %16 = arith.cmpi slt, %14, %15 : vector<8x96xi32>
    %cst_6 = arith.constant -1.000000e+02 : f32
    %17 = vector.broadcast %cst_6 : f32 to vector<8x96xf32>
    %18 = arith.select %16, %17, %0 : vector<8x96xi1>, vector<8x96xf32>
    %cst_7 = arith.constant dense<0xFF800000> : vector<8xf32>
    %19 = vector.multi_reduction <maximumf>, %18, %cst_7 [1] : vector<8x96xf32> to vector<8xf32>
    %20 = vector.shape_cast %19 : vector<8xf32> to vector<8x1xf32>
    %21 = vector.broadcast %20 : vector<8x1xf32> to vector<8x96xf32>
    %22 = arith.cmpf oge, %18, %21 : vector<8x96xf32>
    %c96_i32_8 = arith.constant 96 : i32
    %23 = vector.broadcast %c96_i32_8 : i32 to vector<8x96xi32>
    %24 = arith.select %22, %1, %23 : vector<8x96xi1>, vector<8x96xi32>
    %cst_9 = arith.constant dense<2147483647> : vector<8xi32>
    %25 = vector.multi_reduction <minsi>, %24, %cst_9 [1] : vector<8x96xi32> to vector<8xi32>
    %26 = vector.shape_cast %25 : vector<8xi32> to vector<8x1xi32>
    %c0_10 = arith.constant 0 : index
    %c1 = arith.constant 1 : index
    %27 = vector.load %arg2[%c0_10, %c1] : memref<8x3xf32, #tpu.memory_space<vmem>>, vector<8x1xf32>
    tpu.vector_store %arg2[%c0_10, %c1], %20 {strides = array<i32>} : memref<8x3xf32, #tpu.memory_space<vmem>>, vector<8x1xf32>,
    %c0_11 = arith.constant 0 : index
    %c1_12 = arith.constant 1 : index
    %28 = vector.load %arg3[%c0_11, %c1_12] : memref<8x3xi32, #tpu.memory_space<vmem>>, vector<8x1xi32>
    tpu.vector_store %arg3[%c0_11, %c1_12], %26 {strides = array<i32>} : memref<8x3xi32, #tpu.memory_space<vmem>>, vector<8x1xi32>,
    %29 = vector.broadcast %26 : vector<8x1xi32> to vector<8x96xi32>
    %30 = arith.subi %1, %29 : vector<8x96xi32>
    %31 = math.absi %30 : vector<8x96xi32>
    %c20_i32_13 = arith.constant 20 : i32
    %32 = vector.broadcast %c20_i32_13 : i32 to vector<8x96xi32>
    %33 = arith.cmpi slt, %31, %32 : vector<8x96xi32>
    %cst_14 = arith.constant -1.000000e+02 : f32
    %34 = vector.broadcast %cst_14 : f32 to vector<8x96xf32>
    %35 = arith.select %33, %34, %18 : vector<8x96xi1>, vector<8x96xf32>
    %cst_15 = arith.constant dense<0xFF800000> : vector<8xf32>
    %36 = vector.multi_reduction <maximumf>, %35, %cst_15 [1] : vector<8x96xf32> to vector<8xf32>
    %37 = vector.shape_cast %36 : vector<8xf32> to vector<8x1xf32>
    %38 = vector.broadcast %37 : vector<8x1xf32> to vector<8x96xf32>
    %39 = arith.cmpf oge, %35, %38 : vector<8x96xf32>
    %c96_i32_16 = arith.constant 96 : i32
    %40 = vector.broadcast %c96_i32_16 : i32 to vector<8x96xi32>
    %41 = arith.select %39, %1, %40 : vector<8x96xi1>, vector<8x96xi32>
    %cst_17 = arith.constant dense<2147483647> : vector<8xi32>
    %42 = vector.multi_reduction <minsi>, %41, %cst_17 [1] : vector<8x96xi32> to vector<8xi32>
    %43 = vector.shape_cast %42 : vector<8xi32> to vector<8x1xi32>
    %c0_18 = arith.constant 0 : index
    %c2 = arith.constant 2 : index
    %44 = vector.load %arg2[%c0_18, %c2] : memref<8x3xf32, #tpu.memory_space<vmem>>, vector<8x1xf32>
    tpu.vector_store %arg2[%c0_18, %c2], %37 {strides = array<i32>} : memref<8x3xf32, #tpu.memory_space<vmem>>, vector<8x1xf32>,
    %c0_19 = arith.constant 0 : index
    %c2_20 = arith.constant 2 : index
    %45 = vector.load %arg3[%c0_19, %c2_20] : memref<8x3xi32, #tpu.memory_space<vmem>>, vector<8x1xi32>
    tpu.vector_store %arg3[%c0_19, %c2_20], %43 {strides = array<i32>} : memref<8x3xi32, #tpu.memory_space<vmem>>, vector<8x1xi32>,
    return
  }
  func.func @transform_0(%arg0: i32) -> (i32, i32) {
    %c0_i32 = arith.constant 0 : i32
    %c0_i32_0 = arith.constant 0 : i32
    return %arg0, %c0_i32 : i32, i32
  }
  func.func @transform_1(%arg0: i32) -> (i32, i32) {
    %c0_i32 = arith.constant 0 : i32
    %c0_i32_0 = arith.constant 0 : i32
    return %arg0, %c0_i32 : i32, i32
  }
  func.func @transform_2(%arg0: i32) -> (i32, i32) {
    %c0_i32 = arith.constant 0 : i32
    %c0_i32_0 = arith.constant 0 : i32
    return %arg0, %c0_i32 : i32, i32
  }
}

</mosaic_0001>

<bundles_post_ra>
// kernel: mul.8
= control target key start
LH: loop header
LB: loop body
LE: loop exit
PB: predicated region body
PF: predicated region fallthrough
CT: control target
= control target key end

     0   :  { %vm8_vm0 = vcmask 15360   ;;  %s33_s8 = smov 2   ;;  %vm14_vm1 = vcmask 48160   ;;  %vm20_vm2 = vcmask 31760   ;;  %s50_s0 = inlined_call_operand.vmem [shape: f32[3,2], index: 0, kind: input, shape index: {}]   ;;  %s51_s1 = inlined_call_operand.vmem [shape: f32[6], index: 1, kind: output, shape index: {}]  }
   0x1   :  { %v5_v0 = vld [vmem:[%s50_s0] sm:$0xf]  ;;  %s32_s0 = smov 4  }
   0x2   :  { %6 = vst [vmem:[#allocation1] sm:$0xf] %v5_v0 }
   0x9   :  { %v11_v1 = vld [vmem:[#allocation1 + $0x2] sm:$0x1]   ;;  %v7_v2 = vld [vmem:[#allocation1] sm:$0x1]   ;;  %v17_v3 = vld [vmem:[#allocation1 + $0x1] sm:$0x1]  }
   0xa   :  { %12 = vrot.lane.b32.xlu0 %v11_v1, %s32_s0  ;;  %9 = vst.msk [vmem:[#allocation0] sm:$0x1] %vm8_vm0, %v7_v2  }
   0xe   :  { %18 = vrot.lane.b32.xlu0 %v17_v3, %s33_s8 }
  0x7c   :  { %v13_v4 = vpop.permute.xlu0 %12  }
  0x7d   :  { %15 = vst.msk [vmem:[#allocation0] sm:$0x1] %vm14_vm1, %v13_v4  }
  0x80   :  { %v19_v5 = vpop.permute.xlu0 %18  }
  0x81   :  { %21 = vst.msk [vmem:[#allocation0] sm:$0x1] %vm20_vm2, %v19_v5  }
  0x88   :  { %v26_v6 = vld [vmem:[#allocation0] sm:$0x1] }
  0x89   :  { %29 = vst [vmem:[%s51_s1] sm:$0x1] %v26_v6 }

// kernel: candidate_creator_forward.1
= control target key start
LH: loop header
LB: loop body
LE: loop exit
PB: predicated region body
PF: predicated region fallthrough
CT: control target
= control target key end

     0   :  { %vm13_vm0 = vcmask 785408   ;;  %v11_v2 = vlaneseq  ;;  %vm34_vm1 = vcmask 7168   ;;  %vm63_vm5 = vcmask 15368   ;;  %s153_s0 = inlined_call_operand.vmem [shape: f32[8,96], index: 0, kind: input, shape index: {}]   ;;  %s154_s1 = inlined_call_operand.vmem [shape: f32[8,3], index: 1, kind: output, shape index: {0}]   ;;  %s155_s2 = inlined_call_operand.vmem [shape: s32[8,3], index: 2, kind: output, shape index: {1}]  }
   0x1   :  { %v10_v0 = vld [vmem:[%s153_s0] sm:$0xff]  ;;  %vm92_vm9 = vcmask 23568  }
   0x2   :  { %v14_v1 = vsel %vm13_vm0, %v10_v0, -inf  ;;  %v12_v3 = vand.u32 127, %v11_v2 }
   0x3   :  { %15 = vmax.xlane.f32.xlu0 %v14_v1 }
  0x8c   :  { %v16_v4 = vpop.xlane.xlu0 %15 }
  0x8d   :  { %vm17_vm2 = vcmp.ge.f32.partialorder %v10_v0, %v16_v4  ;;  %35 = vst.msk [vmem:[%s154_s1] sm:$0xff] %vm34_vm1, %v16_v4 }
  0x8e   :  { %v18_v5 = vsel %vm17_vm2, %v12_v3, 96 }
  0x8f   :  { %v19_v6 = vsel %vm13_vm0, %v18_v5, 2147483647 }
  0x90   :  { %v21_v7 = vshra.s32 %v19_v6, 16  ;;  %v20_v9 = vand.u32 65535, %v19_v6 }
  0x92   :  { %v23_v8 = vcvt.s32.f32 %v21_v7  ;;  %v22_v11 = vcvt.s32.f32 %v20_v9 }
  0x94   :  { %24 = vmin.xlane.f32.xlu0 %v23_v8 }
 0x11d   :  { %v25_v10 = vpop.xlane.xlu0 %24 }
 0x11e   :  { %vm26_vm3 = vcmp.eq.f32.partialorder %v23_v8, %v25_v10  ;;  %v31_v13 = vcvt.f32.s32 %v25_v10 }
 0x11f   :  { %v27_v12 = vsel %vm26_vm3, %v22_v11, inf }
 0x120   :  { %28 = vmin.xlane.f32.xlu1 %v27_v12  ;;  %v32_v15 = vshll.u32 %v31_v13, 16 }
 0x1a9   :  { %v29_v14 = vpop.xlane.xlu1 %28 }
 0x1aa   :  { %v30_v16 = vcvt.f32.s32 %v29_v14 }
 0x1ac   :  { %v33_v17 = vadd.s32 %v32_v15, %v30_v16 }
 0x1ae   :  { %36 = vst.msk [vmem:[%s155_s2] sm:$0xff] %vm34_vm1, %v33_v17  ;;  %v37_v18 = vsub.s32 %v12_v3, %v33_v17 }
 0x1b0   :  { %v39_v19 = vsub.s32 0, %v37_v18 }
 0x1b2   :  { %v103_v20 = vmin.u32 %v39_v19, %v37_v18 }
 0x1b4   :  { %vm41_vm4 = vcmp.lt.s32.totalorder %v103_v20, 20 }
 0x1b5   :  { %v42_v21 = vsel %vm41_vm4, -100.0, %v10_v0 }
 0x1b6   :  { %v43_v22 = vsel %vm13_vm0, %v42_v21, -inf }
 0x1b7   :  { %44 = vmax.xlane.f32.xlu1 %v43_v22 }
 0x240   :  { %v45_v23 = vpop.xlane.xlu1 %44 }
 0x241   :  { %vm46_vm6 = vcmp.ge.f32.partialorder %v42_v21, %v45_v23  ;;  %64 = vst.msk [vmem:[%s154_s1] sm:$0xff] %vm63_vm5, %v45_v23 }
 0x242   :  { %v47_v24 = vsel %vm46_vm6, %v12_v3, 96 }
 0x243   :  { %v48_v25 = vsel %vm13_vm0, %v47_v24, 2147483647 }
 0x244   :  { %v50_v26 = vshra.s32 %v48_v25, 16  ;;  %v49_v28 = vand.u32 65535, %v48_v25 }
 0x246   :  { %v52_v27 = vcvt.s32.f32 %v50_v26  ;;  %v51_v30 = vcvt.s32.f32 %v49_v28 }
 0x248   :  { %53 = vmin.xlane.f32.xlu0 %v52_v27 }
 0x2d1   :  { %v54_v29 = vpop.xlane.xlu0 %53 }
 0x2d2   :  { %vm55_vm7 = vcmp.eq.f32.partialorder %v52_v27, %v54_v29  ;;  %v60_v32 = vcvt.f32.s32 %v54_v29 }
 0x2d3   :  { %v56_v31 = vsel %vm55_vm7, %v51_v30, inf }
 0x2d4   :  { %57 = vmin.xlane.f32.xlu1 %v56_v31  ;;  %v61_v34 = vshll.u32 %v60_v32, 16 }
 0x35d   :  { %v58_v33 = vpop.xlane.xlu1 %57 }
 0x35e   :  { %v59_v35 = vcvt.f32.s32 %v58_v33 }
 0x360   :  { %v62_v36 = vadd.s32 %v61_v34, %v59_v35 }
 0x362   :  { %65 = vst.msk [vmem:[%s155_s2] sm:$0xff] %vm63_vm5, %v62_v36  ;;  %v66_v37 = vsub.s32 %v12_v3, %v62_v36 }
 0x364   :  { %v68_v38 = vsub.s32 0, %v66_v37 }
 0x366   :  { %v104_v39 = vmin.u32 %v68_v38, %v66_v37 }
 0x368   :  { %vm70_vm8 = vcmp.lt.s32.totalorder %v104_v39, 20 }
 0x369   :  { %v71_v40 = vsel %vm70_vm8, -100.0, %v42_v21 }
 0x36a   :  { %v72_v41 = vsel %vm13_vm0, %v71_v40, -inf }
 0x36b   :  { %73 = vmax.xlane.f32.xlu0 %v72_v41 }
 0x3f4   :  { %v74_v42 = vpop.xlane.xlu0 %73 }
 0x3f5   :  { %vm75_vm10 = vcmp.ge.f32.partialorder %v71_v40, %v74_v42  ;;  %93 = vst.msk [vmem:[%s154_s1] sm:$0xff] %vm92_vm9, %v74_v42 }
 0x3f6   :  { %v76_v43 = vsel %vm75_vm10, %v12_v3, 96 }
 0x3f7   :  { %v77_v44 = vsel %vm13_vm0, %v76_v43, 2147483647 }
 0x3f8   :  { %v79_v45 = vshra.s32 %v77_v44, 16  ;;  %v78_v47 = vand.u32 65535, %v77_v44 }
 0x3fa   :  { %v81_v46 = vcvt.s32.f32 %v79_v45  ;;  %v80_v49 = vcvt.s32.f32 %v78_v47 }
 0x3fc   :  { %82 = vmin.xlane.f32.xlu1 %v81_v46 }
 0x485   :  { %v83_v48 = vpop.xlane.xlu1 %82 }
 0x486   :  { %vm84_vm11 = vcmp.eq.f32.partialorder %v81_v46, %v83_v48  ;;  %v89_v51 = vcvt.f32.s32 %v83_v48 }
 0x487   :  { %v85_v50 = vsel %vm84_vm11, %v80_v49, inf }
 0x488   :  { %86 = vmin.xlane.f32.xlu0 %v85_v50  ;;  %v90_v53 = vshll.u32 %v89_v51, 16 }
 0x511   :  { %v87_v52 = vpop.xlane.xlu0 %86 }
 0x512   :  { %v88_v54 = vcvt.f32.s32 %v87_v52 }
 0x514   :  { %v91_v55 = vadd.s32 %v90_v53, %v88_v54 }
 0x516   :  { %94 = vst.msk [vmem:[%s155_s2] sm:$0xff] %vm92_vm9, %v91_v55 }

</bundles_post_ra>
